<compile_context>
chip_gen: v7x
topology: tpu7x:2x2x1
jax: 0.10.0
libtpu: 0.0.40
codegen_flags: <defaults>
</compile_context>

<pallas_src>
from functools import partial

import jax
import jax.numpy as jnp
from jax.experimental import pallas as pl
from jax.experimental.pallas import tpu as pltpu


# ---------------------------------------------------------------------------
# Backbone kernel: global average pool over flattened H*W + linear C -> D.
# ---------------------------------------------------------------------------
def _backbone_kernel(x_ref, w_ref, b_ref, o_ref, *, inv_hw):
    # x_ref: (Bg, C, H*W)   w_ref: (C, D)   b_ref: (1, D)   o_ref: (Bg, D)
    pooled = jnp.sum(x_ref[...], axis=-1) * jnp.float32(inv_hw)        # (Bg, C)
    o_ref[...] = (
        jnp.dot(pooled, w_ref[...], preferred_element_type=jnp.float32)
        + b_ref[...]
    ).astype(o_ref.dtype)


def backbone_forward(x, w, b):
    """x: (Bg, C, H, W) crops of a single resolution -> (Bg, D) features."""
    Bg, C, H, W = x.shape
    hw = H * W
    D = w.shape[1]
    x2 = x.reshape(Bg, C, hw)              # lane-dense: spatial axis on lanes
    kernel = partial(_backbone_kernel, inv_hw=1.0 / hw)
    return pl.pallas_call(
        kernel,
        out_shape=jax.ShapeDtypeStruct((Bg, D), x.dtype),
        grid=(1,),
        in_specs=[
            pl.BlockSpec((Bg, C, hw), lambda i: (0, 0, 0)),
            pl.BlockSpec((C, D), lambda i: (0, 0)),
            pl.BlockSpec((1, D), lambda i: (0, 0)),
        ],
        out_specs=pl.BlockSpec((Bg, D), lambda i: (0, 0)),
        compiler_params=pltpu.CompilerParams(dimension_semantics=("parallel",)),
    )(x2, w, b)


# ---------------------------------------------------------------------------
# Head kernel: linear D -> K on the concatenated crop features.
# ---------------------------------------------------------------------------
def _linear_kernel(x_ref, w_ref, b_ref, o_ref):
    o_ref[...] = (
        jnp.dot(x_ref[...], w_ref[...], preferred_element_type=jnp.float32)
        + b_ref[...]
    ).astype(o_ref.dtype)


def head_forward(x, w, b, *, block_m=256):
    """x: (M, D) concatenated features from all crops -> (M, K) outputs."""
    M, D = x.shape
    K = w.shape[1]
    # Largest clean row tile: block_m (multiple of 8) when it divides M,
    # otherwise the full row extent (always legal for the (8,128) rule).
    tm = block_m if (M > block_m and M % block_m == 0) else M
    return pl.pallas_call(
        _linear_kernel,
        out_shape=jax.ShapeDtypeStruct((M, K), x.dtype),
        grid=(M // tm,),
        in_specs=[
            pl.BlockSpec((tm, D), lambda i: (i, 0)),
            pl.BlockSpec((D, K), lambda i: (0, 0)),
            pl.BlockSpec((1, K), lambda i: (0, 0)),
        ],
        out_specs=pl.BlockSpec((tm, K), lambda i: (i, 0)),
        compiler_params=pltpu.CompilerParams(dimension_semantics=("parallel",)),
    )(x, w, b)


# ---------------------------------------------------------------------------
# Module mirrors.
# ---------------------------------------------------------------------------
class Backbone:
    """Resolution-agnostic stand-in backbone (pool + linear)."""
    # TODO(synk): the spec's backbone is an arbitrary nn.Module (e.g. ViT);
    # only a global-avg-pool + linear stand-in is implemented as a Pallas kernel.

    def __init__(self, w, b):
        self.w, self.b = w, b
        self.fc, self.head = None, None   # spec sets these to nn.Identity()

    def __call__(self, x):
        return backbone_forward(x, self.w, self.b)


class Head:
    """Stand-in projection head (single linear layer)."""
    # TODO(synk): DINOHead (MLP + l2-norm + weight-normed last layer) not replicated.

    def __init__(self, w, b):
        self.w, self.b = w, b

    def __call__(self, x):
        return head_forward(x, self.w, self.b)


class MultiCropWrapper:
    """JAX/Pallas mirror of dino.MultiCropWrapper.forward."""

    def __init__(self, backbone, head):
        self.backbone = backbone
        self.head = head

    def __call__(self, x):
        if not isinstance(x, (list, tuple)):
            x = [x]
        # torch.unique_consecutive(resolutions, return_counts=True)[1].cumsum(0)
        # -> group boundaries.  Pure static shape metadata, computed on host.
        res = [int(inp.shape[-1]) for inp in x]
        idx_crops = []
        for i, r in enumerate(res):
            if i + 1 == len(res) or res[i + 1] != r:
                idx_crops.append(i + 1)

        start_idx, outputs = 0, []
        for end_idx in idx_crops:
            grouped = jnp.concatenate(list(x[start_idx:end_idx]), axis=0)
            _out = self.backbone(grouped)
            if isinstance(_out, tuple):
                _out = _out[0]
            outputs.append(_out)
            start_idx = end_idx
        output = jnp.concatenate(outputs, axis=0)
        return self.head(output)


if __name__ == "__main__":
    key = jax.random.PRNGKey(0)
    kx1, kx2, kx3, kwb, kbb, kwh, kbh = jax.random.split(key, 7)

    B, C, D, K = 2, 3, 32, 64
    # Two "global" crops (16x16) + one "local" crop (8x8) -> two resolution groups.
    x = [
        jax.random.normal(kx1, (B, C, 16, 16), dtype=jnp.float32),
        jax.random.normal(kx2, (B, C, 16, 16), dtype=jnp.float32),
        jax.random.normal(kx3, (B, C, 8, 8), dtype=jnp.float32),
    ]

    w_bb = jax.random.normal(kwb, (C, D), dtype=jnp.float32) * 0.1
    b_bb = jax.random.normal(kbb, (1, D), dtype=jnp.float32) * 0.1
    w_h = jax.random.normal(kwh, (D, K), dtype=jnp.float32) * 0.1
    b_h = jax.random.normal(kbh, (1, K), dtype=jnp.float32) * 0.1

    model = MultiCropWrapper(Backbone(w_bb, b_bb), Head(w_h, b_h))
    out = jax.block_until_ready(model(x))
    assert out.shape == (3 * B, K), out.shape

    # Pure-JAX reference of the same forward pass.
    def ref_backbone(img):
        pooled = img.reshape(img.shape[0], img.shape[1], -1).mean(axis=-1)
        return pooled @ w_bb + b_bb

    feats = jnp.concatenate(
        [ref_backbone(jnp.concatenate(x[0:2], axis=0)), ref_backbone(x[2])],
        axis=0,
    )
    ref = feats @ w_h + b_h
    assert bool(jnp.allclose(out, ref, atol=1e-4, rtol=1e-4)), float(
        jnp.max(jnp.abs(out - ref))
    )

    print("KERNEL_OK")
</pallas_src>

<mosaic_0001>
module attributes {stable_mosaic.version = 11 : i64} {
  func.func @_backbone_kernel(%arg0: i32, %arg1: memref<4x3x256xf32, #tpu.memory_space<vmem>>, %arg2: memref<3x32xf32, #tpu.memory_space<vmem>>, %arg3: memref<1x32xf32, #tpu.memory_space<vmem>>, %arg4: memref<4x32xf32, #tpu.memory_space<vmem>>) attributes {dimension_semantics = [#tpu.dimension_semantics<parallel>], iteration_bounds = array<i64: 1>, scalar_prefetch = 0 : i64, scratch_operands = 0 : i64, tpu.core_type = #tpu.core_type<tc>, window_params = [{pipeline_mode = #tpu.pipeline_mode<synchronous>, transform_indices = @transform_0, window_bounds = array<i64: 4, 3, 256>}, {pipeline_mode = #tpu.pipeline_mode<synchronous>, transform_indices = @transform_1, window_bounds = array<i64: 3, 32>}, {pipeline_mode = #tpu.pipeline_mode<synchronous>, transform_indices = @transform_2, window_bounds = array<i64: 1, 32>}, {pipeline_mode = #tpu.pipeline_mode<synchronous>, transform_indices = @transform_3, window_bounds = array<i64: 4, 32>}]} {
    %c0 = arith.constant 0 : index
    %c0_0 = arith.constant 0 : index
    %c0_1 = arith.constant 0 : index
    %0 = vector.load %arg1[%c0, %c0_0, %c0_1] : memref<4x3x256xf32, #tpu.memory_space<vmem>>, vector<4x3x256xf32>
    %cst = arith.constant dense<0.000000e+00> : vector<4x3xf32>
    %1 = vector.multi_reduction <add>, %0, %cst [2] : vector<4x3x256xf32> to vector<4x3xf32>
    %cst_2 = arith.constant 3.906250e-03 : f32
    %2 = vector.broadcast %cst_2 : f32 to vector<4x3xf32>
    %3 = arith.mulf %1, %2 : vector<4x3xf32>
    %c0_3 = arith.constant 0 : index
    %c0_4 = arith.constant 0 : index
    %4 = vector.load %arg2[%c0_3, %c0_4] : memref<3x32xf32, #tpu.memory_space<vmem>>, vector<3x32xf32>
    %cst_5 = arith.constant dense<0.000000e+00> : vector<4x32xf32>
    %5 = tpu.matmul %3, %4, %cst_5 {dimension_numbers = #tpu.dot_dimension_numbers<[1], [0], [0], [1], [0, 0, 1, 1], [], []>} : vector<4x3xf32>, vector<3x32xf32>, vector<4x32xf32> -> vector<4x32xf32>
    %c0_6 = arith.constant 0 : index
    %c0_7 = arith.constant 0 : index
    %6 = vector.load %arg3[%c0_6, %c0_7] : memref<1x32xf32, #tpu.memory_space<vmem>>, vector<1x32xf32>
    %7 = vector.broadcast %6 : vector<1x32xf32> to vector<4x32xf32>
    %8 = arith.addf %5, %7 : vector<4x32xf32>
    %c0_8 = arith.constant 0 : index
    %c0_9 = arith.constant 0 : index
    %9 = vector.load %arg4[%c0_8, %c0_9] : memref<4x32xf32, #tpu.memory_space<vmem>>, vector<4x32xf32>
    tpu.vector_store %arg4[%c0_8, %c0_9], %8 {strides = array<i32>} : memref<4x32xf32, #tpu.memory_space<vmem>>, vector<4x32xf32>,
    return
  }
  func.func @transform_0(%arg0: i32) -> (i32, i32, i32) {
    %c0_i32 = arith.constant 0 : i32
    %c0_i32_0 = arith.constant 0 : i32
    %c0_i32_1 = arith.constant 0 : i32
    %c0_i32_2 = arith.constant 0 : i32
    return %c0_i32, %c0_i32_0, %c0_i32_1 : i32, i32, i32
  }
  func.func @transform_1(%arg0: i32) -> (i32, i32) {
    %c0_i32 = arith.constant 0 : i32
    %c0_i32_0 = arith.constant 0 : i32
    %c0_i32_1 = arith.constant 0 : i32
    return %c0_i32, %c0_i32_0 : i32, i32
  }
  func.func @transform_2(%arg0: i32) -> (i32, i32) {
    %c0_i32 = arith.constant 0 : i32
    %c0_i32_0 = arith.constant 0 : i32
    %c0_i32_1 = arith.constant 0 : i32
    return %c0_i32, %c0_i32_0 : i32, i32
  }
  func.func @transform_3(%arg0: i32) -> (i32, i32) {
    %c0_i32 = arith.constant 0 : i32
    %c0_i32_0 = arith.constant 0 : i32
    %c0_i32_1 = arith.constant 0 : i32
    return %c0_i32, %c0_i32_0 : i32, i32
  }
}

</mosaic_0001>

<bundles_post_ra>
// kernel: tpu_custom_call.1
= control target key start
LH: loop header
LB: loop body
LE: loop exit
PB: predicated region body
PF: predicated region fallthrough
CT: control target
= control target key end

     0   :  { %vm31_vm0 = vcmask 1042432   ;;  %s287_s0 = inlined_call_operand.vmem [shape: f32[4,3,256], index: 0, kind: input, shape index: {}]   ;;  %s288_s1 = inlined_call_operand.vmem [shape: f32[3,32], index: 1, kind: input, shape index: {}]   ;;  %s289_s2 = inlined_call_operand.vmem [shape: f32[1,32], index: 2, kind: input, shape index: {}]   ;;  %s290_s3 = inlined_call_operand.hbm [shape: f32[4,32], index: 3, kind: output, shape index: {}]  }
   0x1   :  { %v15_v0 = vld [vmem:[%s287_s0] sm:$0x77]  ;;  %v17_v1 = vld [vmem:[%s287_s0 + $0x10] sm:$0x77]  ;;  %v16_v6 = vld [vmem:[%s287_s0 + $0x8] sm:$0x77] }
   0x2   :  { %v23_v2 = vcombine.high %v15_v0, %v15_v0  ;;  %v32_v3 = vsel %vm31_vm0, %v15_v0, 0.0  ;;  %v25_v4 = vcombine.high %v17_v1, %v17_v1  ;;  %v42_v5 = vsel %vm31_vm0, %v17_v1, 0.0  ;;  %v18_v7 = vld [vmem:[%s287_s0 + $0x18] sm:$0x77] }
   0x3   :  { %v24_v8 = vcombine.high %v16_v6, %v16_v6  ;;  %v26_v9 = vcombine.high %v18_v7, %v18_v7 }
   0x4   :  { %8 = vsyncpa [#allocation3], 0  ;;  %v33_v10 = vsel %vm31_vm0, %v23_v2, 0.0  ;;  %v43_v11 = vsel %vm31_vm0, %v25_v4, 0.0  ;;  %v37_v12 = vsel %vm31_vm0, %v16_v6, 0.0  ;;  %v47_v13 = vsel %vm31_vm0, %v18_v7, 0.0 }
   0x5   :  { %v34_v14 = vadd.f32 %v33_v10, %v32_v3  ;;  %v44_v15 = vadd.f32 %v43_v11, %v42_v5  ;;  %v38_v16 = vsel %vm31_vm0, %v24_v8, 0.0  ;;  %v48_v17 = vsel %vm31_vm0, %v26_v9, 0.0  ;;  %v56_v20 = vld [vmem:[%s288_s1] sm:$0x7]  ;;  %s227_s22 = smov [#allocation2]  }
   0x6   :  { %v39_v18 = vadd.f32 %v38_v16, %v37_v12  ;;  %v49_v19 = vadd.f32 %v48_v17, %v47_v13  ;;  %v225_v21 = vmov 0.0   ;;  %vm226_vm1 = vmmov 0   ;;  %v184_v41 = vld [vmem:[%s289_s2] ss:$0 sm:$0xff]  ;;  %s176_s23 = sshll.u32 %s227_s22, 4  ;;  %s177_s23 = int_to_ptr.vmem [resolvable:$true] %s176_s23 }
   0x7   :  { %35 = vadd.xlane.f32.xlu0 %v34_v14  ;;  %45 = vadd.xlane.f32.xlu1 %v44_v15  ;;  %v68_v22 = vlaneseq  ;;  %vm86_vm2 = vcmask 1041409   ;;  %vm88_vm3 = vcmask 1042434   ;;  %vm90_vm4 = vcmask 1043459   ;;  %s201_s24 = scalar_lea.vmem %s177_s23, 64  ;;  %p206_p1 = scmp.lt.s32.totalorder %s177_s23, %s177_s23 }
   0x8   :  { %189 = vmatprep.subr.mxu0 %v225_v21  ;;  %191 = vmatprep.mubr.msk.f32.mxu0 %vm226_vm1, %v225_v21  ;;  %vm92_vm5 = vcmask 23552   ;;  %vm168_vm6 = vcmask 257024   ;;  %p202_p0 = scmp.ne.s32.totalorder %s177_s23, %s201_s24  ;;  %p207_p2 = scmp.lt.s32.totalorder %s201_s24, %s201_s24 }
   0x9   :  { %190 = vmatpush3.msk.msra.mxu0 %vm31_vm0, %v56_v20  ;;  %v69_v23 = vand.u32 127, %v68_v22  ;;  %v71_v24 = vshrl.u32 %v68_v22, 7 }
   0xa   :  { %p208_p3 = por %p207_p2, %p206_p1 }
   0xb   :  { %40 = vadd.xlane.f32.xlu0 %v39_v18  ;;  %50 = vadd.xlane.f32.xlu1 %v49_v19  ;;  %v72_v27 = vsub.s32 %v69_v23, %v71_v24 }
   0xc   :  { %p209_p4 = pnand %p208_p3, %p202_p0 }
  0x94   :  { %v36_v25 = vpop.xlane.xlu0 %35  ;;  %v46_v26 = vpop.xlane.xlu1 %45 }
  0x95   :  { %v52_v28 = vmul.f32 0.00390625, %v36_v25  ;;  %v54_v29 = vmul.f32 0.00390625, %v46_v26 }
  0x97   :  { %v73_v34 = vrot.slane %v52_v28, %v72_v27  ;;  %v81_v37 = vrot.slane %v54_v29, %v72_v27 }
  0x98   :  { %v41_v30 = vpop.xlane.xlu0 %40  ;;  %v51_v31 = vpop.xlane.xlu1 %50 }
  0x99   :  { %v53_v32 = vmul.f32 0.00390625, %v41_v30  ;;  %v55_v33 = vmul.f32 0.00390625, %v51_v31 }
  0x9b   :  { %v77_v35 = vrot.slane %v53_v32, %v72_v27  ;;  %v85_v36 = vrot.slane %v55_v33, %v72_v27 }
  0x9d   :  { %v87_v38 = vsel %vm86_vm2, %v77_v35, %v73_v34 }
  0x9e   :  { %v89_v39 = vsel %vm88_vm3, %v81_v37, %v87_v38 }
  0x9f   :  { %v91_v40 = vsel %vm90_vm4, %v85_v36, %v89_v39 }
  0xa0   :  { %192 = vmatmul.mubr.msk.f32.vlgmr.msra.gmra.mrb[0].mxu0 %vm92_vm5, %v91_v40 }
 0x173   :  { %v164_v42 = vpop.f32.mrb[0].mxu0 }
 0x174   :  { %v165_v43 = vadd.f32 %v184_v41, %v164_v42  ;;  %v193_v44 = vpop.f32.mrb[1].mxu0 }
 0x176   :  { %169 = vst.msk [vmem:[#allocation2] sm:$0xf] %vm168_vm6, %v165_v43 }
 0x177   :  { %212 = shalt.err (!%p209_p4)
}
 0x178   :  { %s213_s27 = scalar_lea.hbm %s290_s3, 64 }
 0x179   :  { %p214_p5 = scmp.ne.s32.totalorder %s290_s3, %s213_s27  ;;  %p217_p6 = scmp.lt.u32.totalorder %s213_s27, %s290_s3 }
 0x17b   :  { %p219_p7 = pnand %p217_p6, %p214_p5 }
 0x17d   :  { %222 = shalt.err (!%p219_p7)
}
 0x17e   :  { %179 = dma.vmem_to_hbm [thread:$0]  %s177_s23, 64, %s290_s3, [#allocation3]  }
 0x17f   :  { %223 = dma.done.wait [#allocation3], 64  }
 0x180   :  { %224 = vsyncadd [#allocation3], 4294967232 }
 0x181   :  { %183 = vsyncpa [#allocation3], 1 }

</bundles_post_ra>
